<compile_context>
chip_gen: v7x
topology: tpu7x:2x2x1
jax: 0.10.0
libtpu: 0.0.40
codegen_flags: <defaults>
</compile_context>

<pallas_src>
import functools
import math

import jax
import jax.numpy as jnp
from jax.experimental import pallas as pl
from jax.experimental.pallas import tpu as pltpu


_VMEM_LIMIT_BYTES = 48 * 1024 * 1024  # safe on v5e/v6e (128 MiB) and v7x (64 MiB)


def _round_up(v, m):
    return ((v + m - 1) // m) * m


# --------------------------------------------------------------- x @ W kernel
def xw_kernel(x_ref, w_ref, sup_ref):
    # x_ref: (TM, Fin)   w_ref: (Fin, FoutP)   sup_ref: (TM, FoutP)
    sup_ref[...] = jnp.dot(
        x_ref[...], w_ref[...], preferred_element_type=jnp.float32
    ).astype(sup_ref.dtype)


# --------------------------------------------------------- adj @ support kernel
def adj_matmul_kernel(adj_ref, sup_ref, out_ref, acc_ref):
    # adj_ref: (1, TM, TK)  sup_ref: (1, TK, FoutP)  out_ref: (1, TM, FoutP)
    k = pl.program_id(2)

    @pl.when(k == 0)
    def _():
        acc_ref[...] = jnp.zeros_like(acc_ref)

    acc_ref[...] += jnp.dot(
        adj_ref[0], sup_ref[0], preferred_element_type=jnp.float32
    )

    @pl.when(k == pl.num_programs(2) - 1)
    def _():
        out_ref[0] = acc_ref[...].astype(out_ref.dtype)


def adj_matmul_bias_kernel(adj_ref, sup_ref, b_ref, out_ref, acc_ref):
    k = pl.program_id(2)

    @pl.when(k == 0)
    def _():
        acc_ref[...] = jnp.zeros_like(acc_ref)

    acc_ref[...] += jnp.dot(
        adj_ref[0], sup_ref[0], preferred_element_type=jnp.float32
    )

    @pl.when(k == pl.num_programs(2) - 1)
    def _():
        out_ref[0] = (acc_ref[...] + b_ref[...]).astype(out_ref.dtype)


def gcn_forward_pallas(x, adj, weight, bias=None, *, node_tile=512,
                       compute_dtype=None):
    """output = adj @ (x @ weight) (+ bias).

    compute_dtype=jnp.bfloat16 feeds the MXU bf16 operands (recommended on
    v6e/v7x, ~2x) while keeping f32 accumulation; default keeps f32 inputs.
    """
    B, N, Fin = x.shape
    Fout = weight.shape[1]

    if compute_dtype is not None:
        x = x.astype(compute_dtype)
        adj = adj.astype(compute_dtype)
        weight = weight.astype(compute_dtype)

    # Tiling: one node tile used for both M and K of the adjacency contraction.
    tn = min(node_tile, _round_up(N, 8))
    npad = _round_up(N, tn)
    foutp = _round_up(Fout, 128)          # lane-dense output / MXU N-dim

    if npad != N:
        x = jnp.pad(x, ((0, 0), (0, npad - N), (0, 0)))
        adj = jnp.pad(adj, ((0, 0), (0, npad - N), (0, npad - N)))
    w_p = weight if foutp == Fout else jnp.pad(weight, ((0, 0), (0, foutp - Fout)))

    sup_dtype = x.dtype if compute_dtype is not None else jnp.float32

    # ---- kernel 1: support = x @ W over collapsed (B*Npad) rows ------------
    rows = B * npad
    x2 = x.reshape(rows, Fin)
    support = pl.pallas_call(
        xw_kernel,
        out_shape=jax.ShapeDtypeStruct((rows, foutp), sup_dtype),
        grid_spec=pltpu.PrefetchScalarGridSpec(
            num_scalar_prefetch=0,
            grid=(rows // tn,),
            in_specs=[
                pl.BlockSpec((tn, Fin), lambda i: (i, 0)),
                pl.BlockSpec((Fin, foutp), lambda i: (0, 0)),
            ],
            out_specs=pl.BlockSpec((tn, foutp), lambda i: (i, 0)),
        ),
        compiler_params=pltpu.CompilerParams(
            dimension_semantics=("parallel",),
            vmem_limit_bytes=_VMEM_LIMIT_BYTES),
    )(x2, w_p)
    support = support.reshape(B, npad, foutp)

    # ---- kernel 2: out = adj @ support (+ bias) -----------------------------
    grid = (B, npad // tn, npad // tn)
    in_specs = [
        pl.BlockSpec((1, tn, tn), lambda b, i, k: (b, i, k)),
        pl.BlockSpec((1, tn, foutp), lambda b, i, k: (b, k, 0)),
    ]
    if bias is not None:
        bias_p = bias.reshape(1, Fout).astype(jnp.float32)
        if foutp != Fout:
            bias_p = jnp.pad(bias_p, ((0, 0), (0, foutp - Fout)))
        in_specs.append(pl.BlockSpec((1, foutp), lambda b, i, k: (0, 0)))
        kernel = adj_matmul_bias_kernel
        args = (adj, support, bias_p)
    else:
        kernel = adj_matmul_kernel
        args = (adj, support)

    out = pl.pallas_call(
        kernel,
        out_shape=jax.ShapeDtypeStruct((B, npad, foutp), jnp.float32),
        grid_spec=pltpu.PrefetchScalarGridSpec(
            num_scalar_prefetch=0,
            grid=grid,
            in_specs=in_specs,
            out_specs=pl.BlockSpec((1, tn, foutp), lambda b, i, k: (b, i, 0)),
            scratch_shapes=[pltpu.VMEM((tn, foutp), jnp.float32)],
        ),
        compiler_params=pltpu.CompilerParams(
            dimension_semantics=("parallel", "parallel", "arbitrary"),
            vmem_limit_bytes=_VMEM_LIMIT_BYTES),
    )(*args)

    return out[:, :N, :Fout]


# ----------------------------------------------------- supervised MSE loss kernel
def super_loss_kernel(adj_ref, sup_ref, mask_ref, loss_ref, acc_ref, *, inv_count):
    # adj_ref / sup_ref / mask_ref: (TM, N) row tiles; loss_ref/acc_ref: (1, 1)
    t = pl.program_id(0)

    @pl.when(t == 0)
    def _():
        acc_ref[...] = jnp.zeros_like(acc_ref)

    adj_label = jnp.minimum(
        sup_ref[...].astype(jnp.float32) + mask_ref[...].astype(jnp.float32), 0.5)
    diff = adj_ref[...].astype(jnp.float32) - adj_label
    acc_ref[...] += jnp.sum(diff * diff, keepdims=True)

    @pl.when(t == pl.num_programs(0) - 1)
    def _():
        loss_ref[...] = acc_ref[...] * inv_count


def super_loss_pallas(adj, super_adj, rng_key, neg_ratio=0.2, row_tile=512):
    B, N, _ = adj.shape
    rows = B * N
    # Bernoulli noise generated in the wrapper (see TODO at top of file).
    mask = jax.random.bernoulli(rng_key, neg_ratio, adj.shape).astype(adj.dtype)

    # Pure metadata reshapes (contiguous) -- no extra HBM copies, no astype here.
    adj2 = adj.reshape(rows, N)
    sup2 = super_adj.reshape(rows, N)
    mask2 = mask.reshape(rows, N)

    tm = min(row_tile, _round_up(rows, 8))
    rpad = _round_up(rows, tm)
    if rpad != rows:
        pad = rpad - rows
        # Zero padding keeps the padded contribution exactly zero:
        # label = min(0 + 0, 0.5) = 0, adj = 0 -> diff = 0.
        adj2 = jnp.pad(adj2, ((0, pad), (0, 0)))
        sup2 = jnp.pad(sup2, ((0, pad), (0, 0)))
        mask2 = jnp.pad(mask2, ((0, pad), (0, 0)))

    inv_count = 1.0 / float(rows * N)
    out = pl.pallas_call(
        functools.partial(super_loss_kernel, inv_count=inv_count),
        out_shape=jax.ShapeDtypeStruct((1, 1), jnp.float32),
        grid_spec=pltpu.PrefetchScalarGridSpec(
            num_scalar_prefetch=0,
            grid=(rpad // tm,),
            in_specs=[
                pl.BlockSpec((tm, N), lambda t: (t, 0)),
                pl.BlockSpec((tm, N), lambda t: (t, 0)),
                pl.BlockSpec((tm, N), lambda t: (t, 0)),
            ],
            out_specs=pl.BlockSpec((1, 1), lambda t: (0, 0)),
            scratch_shapes=[pltpu.VMEM((1, 1), jnp.float32)],
        ),
        compiler_params=pltpu.CompilerParams(
            dimension_semantics=("arbitrary",),
            vmem_limit_bytes=_VMEM_LIMIT_BYTES),
    )(adj2, sup2, mask2)
    return out[0, 0]


# -------------------------------------------------------------------- module API
def super_gcn_forward(x, adj, weight, bias=None, super_adj=None, rng_key=None,
                      neg_sample_ratio=0.2, compute_dtype=None):
    if super_adj is not None:
        if rng_key is None:
            rng_key = jax.random.PRNGKey(0)
        super_loss = super_loss_pallas(adj, super_adj, rng_key, neg_sample_ratio)
    else:
        super_loss = None
    output = gcn_forward_pallas(x, adj, weight, bias, compute_dtype=compute_dtype)
    return output, super_loss


if __name__ == "__main__":
    B, N, IN_F, OUT_F = 2, 8, 16, 32

    key = jax.random.PRNGKey(0)
    k_w, k_x, k_adj, k_sup, k_bern = jax.random.split(key, 5)

    # Deterministic parameter init mirroring uniform(-stdv, stdv), stdv = 1/sqrt(out_f)
    stdv = 1.0 / math.sqrt(OUT_F)
    weight = jax.random.uniform(k_w, (IN_F, OUT_F), jnp.float32, -stdv, stdv)
    bias = None  # module default bias=False

    x = jax.random.normal(k_x, (B, N, IN_F), dtype=jnp.float32)
    adj = jax.random.uniform(k_adj, (B, N, N), dtype=jnp.float32)
    super_adj = (jax.random.uniform(k_sup, (B, N, N)) > 0.7).astype(jnp.float32)

    out, loss = super_gcn_forward(x, adj, weight, bias=bias,
                                  super_adj=super_adj, rng_key=k_bern)
    out = jax.block_until_ready(out)
    loss = jax.block_until_ready(loss)

    # Reference check for the deterministic matmul path.
    ref = jnp.einsum("bij,bjf->bif", adj, jnp.einsum("bni,if->bnf", x, weight))
    assert out.shape == (B, N, OUT_F)
    assert jnp.allclose(out, ref, atol=1e-5, rtol=1e-5), "GCN output mismatch"
    assert jnp.isfinite(loss), "super_loss is not finite"

    print("KERNEL_OK")
</pallas_src>

<mosaic_0001>
module attributes {stable_mosaic.version = 11 : i64} {
  func.func @super_loss_kernel(%arg0: i32, %arg1: memref<16x8xf32, #tpu.memory_space<vmem>>, %arg2: memref<16x8xf32, #tpu.memory_space<vmem>>, %arg3: memref<16x8xf32, #tpu.memory_space<vmem>>, %arg4: memref<1x1xf32, #tpu.memory_space<vmem>>, %arg5: memref<1x1xf32, #tpu.memory_space<vmem>>) attributes {dimension_semantics = [#tpu.dimension_semantics<arbitrary>], iteration_bounds = array<i64: 1>, scalar_prefetch = 0 : i64, scratch_operands = 1 : i64, tpu.core_type = #tpu.core_type<tc>, window_params = [{transform_indices = @transform_0, window_bounds = array<i64: 16, 8>}, {transform_indices = @transform_1, window_bounds = array<i64: 16, 8>}, {transform_indices = @transform_2, window_bounds = array<i64: 16, 8>}, {pipeline_mode = #tpu.pipeline_mode<synchronous>, transform_indices = @transform_3, window_bounds = array<i64: 1, 1>}]} {
    %c0_i32 = arith.constant 0 : i32
    %0 = arith.cmpi eq, %arg0, %c0_i32 : i32
    %1 = arith.extui %0 : i1 to i32
    %c0_i32_0 = arith.constant 0 : i32
    %2 = arith.cmpi ne, %1, %c0_i32_0 : i32
    scf.if %2 {
      %cst_13 = arith.constant 0.000000e+00 : f32
      %22 = vector.broadcast %cst_13 : f32 to vector<1x1xf32>
      %c0_14 = arith.constant 0 : index
      %c0_15 = arith.constant 0 : index
      %23 = vector.load %arg5[%c0_14, %c0_15] : memref<1x1xf32, #tpu.memory_space<vmem>>, vector<1x1xf32>
      tpu.vector_store %arg5[%c0_14, %c0_15], %22 {strides = array<i32>} : memref<1x1xf32, #tpu.memory_space<vmem>>, vector<1x1xf32>,
    } else {
    }
    %c0 = arith.constant 0 : index
    %c0_1 = arith.constant 0 : index
    %3 = vector.load %arg2[%c0, %c0_1] : memref<16x8xf32, #tpu.memory_space<vmem>>, vector<16x8xf32>
    %c0_2 = arith.constant 0 : index
    %c0_3 = arith.constant 0 : index
    %4 = vector.load %arg3[%c0_2, %c0_3] : memref<16x8xf32, #tpu.memory_space<vmem>>, vector<16x8xf32>
    %5 = arith.addf %3, %4 : vector<16x8xf32>
    %cst = arith.constant 5.000000e-01 : f32
    %6 = vector.broadcast %cst : f32 to vector<16x8xf32>
    %7 = arith.minimumf %5, %6 : vector<16x8xf32>
    %c0_4 = arith.constant 0 : index
    %c0_5 = arith.constant 0 : index
    %8 = vector.load %arg1[%c0_4, %c0_5] : memref<16x8xf32, #tpu.memory_space<vmem>>, vector<16x8xf32>
    %9 = arith.subf %8, %7 : vector<16x8xf32>
    %c0_6 = arith.constant 0 : index
    %c0_7 = arith.constant 0 : index
    %10 = vector.load %arg5[%c0_6, %c0_7] : memref<1x1xf32, #tpu.memory_space<vmem>>, vector<1x1xf32>
    %11 = arith.mulf %9, %9 : vector<16x8xf32>
    %12 = vector.shape_cast %11 : vector<16x8xf32> to vector<1x16x8xf32>
    %cst_8 = arith.constant dense<0.000000e+00> : vector<1xf32>
    %13 = vector.multi_reduction <add>, %12, %cst_8 [1, 2] : vector<1x16x8xf32> to vector<1xf32>
    %14 = vector.shape_cast %13 : vector<1xf32> to vector<1x1x1xf32>
    %15 = vector.extract %14[0, 0, 0] : f32 from vector<1x1x1xf32>
    %16 = vector.broadcast %15 : f32 to vector<1x1xf32>
    %17 = arith.addf %10, %16 : vector<1x1xf32>
    %c0_9 = arith.constant 0 : index
    %c0_10 = arith.constant 0 : index
    %18 = vector.load %arg5[%c0_9, %c0_10] : memref<1x1xf32, #tpu.memory_space<vmem>>, vector<1x1xf32>
    tpu.vector_store %arg5[%c0_9, %c0_10], %17 {strides = array<i32>} : memref<1x1xf32, #tpu.memory_space<vmem>>, vector<1x1xf32>,
    %c0_i32_11 = arith.constant 0 : i32
    %19 = arith.cmpi eq, %arg0, %c0_i32_11 : i32
    %20 = arith.extui %19 : i1 to i32
    %c0_i32_12 = arith.constant 0 : i32
    %21 = arith.cmpi ne, %20, %c0_i32_12 : i32
    scf.if %21 {
      %c0_13 = arith.constant 0 : index
      %c0_14 = arith.constant 0 : index
      %22 = vector.load %arg5[%c0_13, %c0_14] : memref<1x1xf32, #tpu.memory_space<vmem>>, vector<1x1xf32>
      %cst_15 = arith.constant 7.812500e-03 : f32
      %23 = vector.broadcast %cst_15 : f32 to vector<1x1xf32>
      %24 = arith.mulf %22, %23 : vector<1x1xf32>
      %c0_16 = arith.constant 0 : index
      %c0_17 = arith.constant 0 : index
      %25 = vector.load %arg4[%c0_16, %c0_17] : memref<1x1xf32, #tpu.memory_space<vmem>>, vector<1x1xf32>
      tpu.vector_store %arg4[%c0_16, %c0_17], %24 {strides = array<i32>} : memref<1x1xf32, #tpu.memory_space<vmem>>, vector<1x1xf32>,
    } else {
    }
    return
  }
  func.func @transform_0(%arg0: i32) -> (i32, i32) {
    %c0_i32 = arith.constant 0 : i32
    %c0_i32_0 = arith.constant 0 : i32
    return %arg0, %c0_i32 : i32, i32
  }
  func.func @transform_1(%arg0: i32) -> (i32, i32) {
    %c0_i32 = arith.constant 0 : i32
    %c0_i32_0 = arith.constant 0 : i32
    return %arg0, %c0_i32 : i32, i32
  }
  func.func @transform_2(%arg0: i32) -> (i32, i32) {
    %c0_i32 = arith.constant 0 : i32
    %c0_i32_0 = arith.constant 0 : i32
    return %arg0, %c0_i32 : i32, i32
  }
  func.func @transform_3(%arg0: i32) -> (i32, i32) {
    %c0_i32 = arith.constant 0 : i32
    %c0_i32_0 = arith.constant 0 : i32
    %c0_i32_1 = arith.constant 0 : i32
    return %c0_i32, %c0_i32_0 : i32, i32
  }
}

</mosaic_0001>

<bundles_post_ra>
// kernel: tpu_custom_call.1
= control target key start
LH: loop header
LB: loop body
LE: loop exit
PB: predicated region body
PF: predicated region fallthrough
CT: control target
= control target key end

     0   :  { %s156_s0 = inlined_call_operand.vmem [shape: f32[16,8], index: 0, kind: input, shape index: {}]   ;;  %s157_s1 = inlined_call_operand.vmem [shape: f32[16,8], index: 1, kind: input, shape index: {}]   ;;  %s158_s2 = inlined_call_operand.vmem [shape: f32[16,8], index: 2, kind: input, shape index: {}]   ;;  %s159_s3 = inlined_call_operand.hbm [shape: f32[1,1], index: 3, kind: output, shape index: {}]  }
   0x1   :  { %v21_v0 = vld [vmem:[%s157_s1] sm:$0xff]  ;;  %v22_v1 = vld [vmem:[%s157_s1 + $0x8] sm:$0xff] }
   0x2   :  { %v23_v2 = vld [vmem:[%s158_s2] sm:$0xff]  ;;  %v24_v3 = vld [vmem:[%s158_s2 + $0x8] sm:$0xff] }
   0x3   :  { %v25_v4 = vadd.f32 %v23_v2, %v21_v0  ;;  %v26_v5 = vadd.f32 %v24_v3, %v22_v1  ;;  %v29_v6 = vld [vmem:[%s156_s0] sm:$0xff] }
   0x4   :  { %8 = vsyncpa [#allocation4], 0  ;;  %v30_v8 = vld [vmem:[%s156_s0 + $0x8] sm:$0xff]  ;;  %vm36_vm0 = vcmask 64512   ;;  %vm19_vm1 = vcmask 0   ;;  %v101_v17 = vmov 0.0  }
   0x5   :  { %v27_v7 = vmin.f32 %v25_v4, 0.5  ;;  %v28_v9 = vmin.f32 %v26_v5, 0.5  ;;  %20 = vst.msk [vmem:[#allocation2] sm:$0x1] %vm19_vm1, %v101_v17  ;;  %s102_s1 = smov [#allocation3]  }
   0x6   :  { %s65_s2 = sshll.u32 %s102_s1, 4  ;;  %s66_s2 = int_to_ptr.vmem [resolvable:$true] %s65_s2 }
   0x7   :  { %v31_v10 = vsub.f32 %v29_v6, %v27_v7  ;;  %v32_v11 = vsub.f32 %v30_v8, %v28_v9  ;;  %s77_s24 = scalar_lea.vmem %s66_s2, 16  ;;  %s81_s25 = scalar_lea.vmem %s66_s2, 32 }
   0x8   :  { %p78_p0 = scmp.ne.s32.totalorder %s66_s2, %s77_s24  ;;  %p82_p1 = scmp.lt.s32.totalorder %s66_s2, %s66_s2 }
   0x9   :  { %v34_v12 = vmul.f32 %v31_v10, %v31_v10  ;;  %v35_v13 = vmul.f32 %v32_v11, %v32_v11  ;;  %p83_p2 = scmp.lt.s32.totalorder %s81_s25, %s77_s24 }
   0xb   :  { %v37_v14 = vsel %vm36_vm0, %v34_v12, 0.0  ;;  %v38_v15 = vsel %vm36_vm0, %v35_v13, 0.0  ;;  %p84_p3 = por %p83_p2, %p82_p1 }
   0xc   :  { %v39_v16 = vadd.f32 %v38_v15, %v37_v14  ;;  %v33_v25 = vld [vmem:[#allocation2] sm:$0x1] }
   0xd   :  { %p85_p4 = pnand %p84_p3, %p78_p0 }
   0xe   :  { %40 = vadd.xlane.f32.xlu0 %v39_v16 }
  0x9b   :  { %v41_v18 = vpop.xlane.xlu0 %40 }
  0x9c   :  { %v42_v19 = vrot.slane %v41_v18, 4 }
  0x9e   :  { %v43_v20 = vadd.f32 %v42_v19, %v41_v18 }
  0xa0   :  { %v44_v21 = vrot.slane %v43_v20, 2 }
  0xa2   :  { %v45_v22 = vadd.f32 %v44_v21, %v43_v20 }
  0xa4   :  { %v46_v23 = vrot.slane %v45_v22, 1 }
  0xa6   :  { %v47_v24 = vadd.f32 %v46_v23, %v45_v22 }
  0xa8   :  { %73 = vpush %v47_v24 }
  0xd9   :  { %s74_s0 = spop %73 }
  0xda   :  { %v49_v26 = vstv %s74_s0 }
  0xdb   :  { %v50_v27 = vadd.f32 %v49_v26, %v33_v25 }
  0xdd   :  { %52 = vst.msk [vmem:[#allocation2] sm:$0x1] %vm19_vm1, %v50_v27 }
  0xe4   :  { %v56_v28 = vld [vmem:[#allocation2] sm:$0x1] }
  0xe5   :  { %v57_v29 = vmul.f32 0.0078125, %v56_v28 }
  0xe7   :  { %58 = vst.msk [vmem:[#allocation3] sm:$0x1] %vm19_vm1, %v57_v29 }
  0xe8   :  { %88 = shalt.err (!%p85_p4)
}
  0xe9   :  { %s89_s28 = scalar_lea.hbm %s159_s3, 16 }
  0xea   :  { %p90_p5 = scmp.ne.s32.totalorder %s159_s3, %s89_s28  ;;  %p93_p6 = scmp.lt.u32.totalorder %s89_s28, %s159_s3 }
  0xec   :  { %p95_p7 = pnand %p93_p6, %p90_p5 }
  0xee   :  { %98 = shalt.err (!%p95_p7)
}
  0xef   :  { %68 = dma.vmem_to_hbm [thread:$0]  %s66_s2, 16, %s159_s3, [#allocation4]  }
  0xf0   :  { %99 = dma.done.wait [#allocation4], 16  }
  0xf1   :  { %100 = vsyncadd [#allocation4], 4294967280 }
  0xf2   :  { %72 = vsyncpa [#allocation4], 1 }

</bundles_post_ra>
